<compile_context>
chip_gen: v6e
topology: v6e:2x2x1
jax: 0.10.0
libtpu: 0.0.40
codegen_flags: <defaults>
</compile_context>

<pallas_src>
import jax
import jax.numpy as jnp
from jax.experimental import pallas as pl
from jax.experimental.pallas import tpu as pltpu

HIDDEN = 64


def _mlp_kernel(x_ref, w1_ref, b1_ref, w2_ref, b2_ref, w3_ref, b3_ref, o_ref):
    # Fused 3-layer MLP on one (TB, S) batch tile.
    # Input arrives as f32 straight from HBM; cast to bf16 here on the VPU
    # instead of materializing a bf16 copy of the batch in the wrapper.
    x = x_ref[...].astype(jnp.bfloat16)                      # (TB, S)
    w1 = w1_ref[...].astype(jnp.bfloat16)                    # tiny, resident
    w2 = w2_ref[...].astype(jnp.bfloat16)
    w3 = w3_ref[...].astype(jnp.bfloat16)

    h1 = jnp.dot(x, w1, preferred_element_type=jnp.float32) + b1_ref[...]
    h1 = jnp.maximum(h1, 0.0)
    h2 = jnp.dot(h1.astype(jnp.bfloat16), w2,
                 preferred_element_type=jnp.float32) + b2_ref[...]
    h2 = jnp.maximum(h2, 0.0)
    # TODO(synk): on v6e/v7x the 64->4 head could run on VPU/XLU (broadcast
    # mul + lane reduce) to shave ~1/3 of MXU pushes; kept on the MXU here
    # for simplicity/portability.
    o_ref[...] = jnp.dot(h2.astype(jnp.bfloat16), w3,
                         preferred_element_type=jnp.float32) + b3_ref[...]


def _round_up(x, m):
    return (x + m - 1) // m * m


def neural_network_forward(state, params, *, block_batch=2048,
                           min_pallas_rows=256, force_pallas=False):
    """state: (B, state_size) float32. Returns (B, action_size) float32."""
    w1, b1, w2, b2, w3, b3 = params
    B, S = state.shape
    A = w3.shape[1]

    # Tiny per-env-step batches: the Pallas grid/pipeline machinery is pure
    # launch + DMA latency overhead; let XLA's fused dots handle it.
    if B < min_pallas_rows and not force_pallas:
        return _ref_bf16(state, params)

    # Pick #grid-steps first, then the smallest 16-aligned (bf16 sublane) tile
    # covering B in that many steps -> last-tile padding is at most 15 rows.
    n_steps = -(-B // block_batch)                 # ceil
    TB = _round_up(-(-B // n_steps), 16)
    B_pad = _round_up(B, TB)
    grid = (B_pad // TB,)

    x = state
    if B_pad != B:
        x = jnp.pad(x, ((0, B_pad - B), (0, 0)))   # <=15 rows of zeros

    cost = pl.CostEstimate(
        flops=2 * B_pad * (S * HIDDEN + HIDDEN * HIDDEN + HIDDEN * A),
        transcendentals=0,
        bytes_accessed=(B_pad * S * 4
                        + sum(int(p.size) * p.dtype.itemsize for p in params)
                        + B_pad * A * 4),
    )

    const = lambda i: (0, 0)  # weights/biases: resident, never re-indexed
    out = pl.pallas_call(
        _mlp_kernel,
        out_shape=jax.ShapeDtypeStruct((B_pad, A), jnp.float32),
        grid=grid,
        in_specs=[
            pl.BlockSpec((TB, S), lambda i: (i, 0)),      # x: tiled over batch
            pl.BlockSpec((S, HIDDEN), const),             # w1
            pl.BlockSpec((1, HIDDEN), const),             # b1
            pl.BlockSpec((HIDDEN, HIDDEN), const),        # w2
            pl.BlockSpec((1, HIDDEN), const),             # b2
            pl.BlockSpec((HIDDEN, A), const),             # w3
            pl.BlockSpec((1, A), const),                  # b3
        ],
        out_specs=pl.BlockSpec((TB, A), lambda i: (i, 0)),
        compiler_params=pltpu.CompilerParams(
            dimension_semantics=("parallel",)),           # megacore on v7x
        cost_estimate=cost,
    )(x, w1, b1, w2, b2, w3, b3)

    return out[:B] if B_pad != B else out


def init_params(key, state_size, action_size, hidden=HIDDEN):
    """Deterministic init mimicking nn.Linear default (uniform +-1/sqrt(fan_in)).
    Weights stored as (in, out) f32 (PyTorch parity); biases (1, out) f32."""
    ks = jax.random.split(key, 6)

    def linear(kw, kb, fan_in, fan_out):
        bound = 1.0 / jnp.sqrt(jnp.float32(fan_in))
        w = jax.random.uniform(kw, (fan_in, fan_out), jnp.float32, -bound, bound)
        b = jax.random.uniform(kb, (1, fan_out), jnp.float32, -bound, bound)
        return w, b

    w1, b1 = linear(ks[0], ks[1], state_size, hidden)
    w2, b2 = linear(ks[2], ks[3], hidden, hidden)
    w3, b3 = linear(ks[4], ks[5], hidden, action_size)
    return (w1, b1, w2, b2, w3, b3)


def _ref_bf16(state, params):
    """Pure-JAX reference with the same bf16-operand / f32-accumulate rounding."""
    w1, b1, w2, b2, w3, b3 = params

    def mm(a, w):
        return jnp.dot(a.astype(jnp.bfloat16), w.astype(jnp.bfloat16),
                       preferred_element_type=jnp.float32)

    h = jnp.maximum(mm(state, w1) + b1, 0.0)
    h = jnp.maximum(mm(h, w2) + b2, 0.0)
    return mm(h, w3) + b3


def _ref_f32(state, params):
    """Full-f32 reference matching the PyTorch module semantics."""
    w1, b1, w2, b2, w3, b3 = params
    h = jnp.maximum(state @ w1 + b1, 0.0)
    h = jnp.maximum(h @ w2 + b2, 0.0)
    return h @ w3 + b3


if __name__ == "__main__":
    # LunarLander-v2: observation dim 8, action dim 4.
    state_size, action_size, batch = 8, 4, 2

    key = jax.random.PRNGKey(0)
    k_params, k_state, k_big = jax.random.split(key, 3)
    params = init_params(k_params, state_size, action_size)

    # Small (per-env-step) batch: force the Pallas path so the kernel runs.
    state = jax.random.normal(k_state, (batch, state_size), jnp.float32)
    out = jax.block_until_ready(
        neural_network_forward(state, params, force_pallas=True))
    assert out.shape == (batch, action_size)
    assert jnp.allclose(out, _ref_bf16(state, params), atol=2e-2, rtol=2e-2), \
        "mismatch vs bf16 reference"
    assert jnp.allclose(out, _ref_f32(state, params), atol=1e-1, rtol=1e-1), \
        "mismatch vs f32 reference"

    # Larger, awkward batch: exercises multi-step grid (3 steps of 352 rows)
    # and the adaptive-tile partial padding (26 rows, not a whole tile).
    big = jax.random.normal(k_big, (1030, state_size), jnp.float32)
    out_big = jax.block_until_ready(
        neural_network_forward(big, params, block_batch=512))
    assert out_big.shape == (1030, action_size)
    assert jnp.allclose(out_big, _ref_bf16(big, params), atol=2e-2, rtol=2e-2), \
        "mismatch vs bf16 reference (tiled)"
    assert jnp.allclose(out_big, _ref_f32(big, params), atol=1e-1, rtol=1e-1), \
        "mismatch vs f32 reference (tiled)"

    print("KERNEL_OK")
</pallas_src>

<mosaic_0001>
module attributes {stable_mosaic.version = 11 : i64} {
  func.func @_mlp_kernel(%arg0: i32, %arg1: memref<16x8xf32, #tpu.memory_space<vmem>>, %arg2: memref<8x64xf32, #tpu.memory_space<vmem>>, %arg3: memref<1x64xf32, #tpu.memory_space<vmem>>, %arg4: memref<64x64xf32, #tpu.memory_space<vmem>>, %arg5: memref<1x64xf32, #tpu.memory_space<vmem>>, %arg6: memref<64x4xf32, #tpu.memory_space<vmem>>, %arg7: memref<1x4xf32, #tpu.memory_space<vmem>>, %arg8: memref<16x4xf32, #tpu.memory_space<vmem>>) attributes {dimension_semantics = [#tpu.dimension_semantics<parallel>], iteration_bounds = array<i64: 1>, scalar_prefetch = 0 : i64, scratch_operands = 0 : i64, tpu.core_type = #tpu.core_type<tc>, window_params = [{transform_indices = @transform_0, window_bounds = array<i64: 16, 8>}, {pipeline_mode = #tpu.pipeline_mode<synchronous>, transform_indices = @transform_1, window_bounds = array<i64: 8, 64>}, {pipeline_mode = #tpu.pipeline_mode<synchronous>, transform_indices = @transform_2, window_bounds = array<i64: 1, 64>}, {pipeline_mode = #tpu.pipeline_mode<synchronous>, transform_indices = @transform_3, window_bounds = array<i64: 64, 64>}, {pipeline_mode = #tpu.pipeline_mode<synchronous>, transform_indices = @transform_4, window_bounds = array<i64: 1, 64>}, {pipeline_mode = #tpu.pipeline_mode<synchronous>, transform_indices = @transform_5, window_bounds = array<i64: 64, 4>}, {pipeline_mode = #tpu.pipeline_mode<synchronous>, transform_indices = @transform_6, window_bounds = array<i64: 1, 4>}, {transform_indices = @transform_7, window_bounds = array<i64: 16, 4>}]} {
    %c0 = arith.constant 0 : index
    %c0_0 = arith.constant 0 : index
    %0 = vector.load %arg1[%c0, %c0_0] : memref<16x8xf32, #tpu.memory_space<vmem>>, vector<16x8xf32>
    %1 = arith.truncf %0 : vector<16x8xf32> to vector<16x8xbf16>
    %c0_1 = arith.constant 0 : index
    %c0_2 = arith.constant 0 : index
    %2 = vector.load %arg2[%c0_1, %c0_2] : memref<8x64xf32, #tpu.memory_space<vmem>>, vector<8x64xf32>
    %3 = arith.truncf %2 : vector<8x64xf32> to vector<8x64xbf16>
    %c0_3 = arith.constant 0 : index
    %c0_4 = arith.constant 0 : index
    %4 = vector.load %arg4[%c0_3, %c0_4] : memref<64x64xf32, #tpu.memory_space<vmem>>, vector<64x64xf32>
    %5 = arith.truncf %4 : vector<64x64xf32> to vector<64x64xbf16>
    %c0_5 = arith.constant 0 : index
    %c0_6 = arith.constant 0 : index
    %6 = vector.load %arg6[%c0_5, %c0_6] : memref<64x4xf32, #tpu.memory_space<vmem>>, vector<64x4xf32>
    %7 = arith.truncf %6 : vector<64x4xf32> to vector<64x4xbf16>
    %cst = arith.constant dense<0.000000e+00> : vector<16x64xf32>
    %8 = tpu.matmul %1, %3, %cst {dimension_numbers = #tpu.dot_dimension_numbers<[1], [0], [0], [1], [0, 0, 1, 1], [], []>} : vector<16x8xbf16>, vector<8x64xbf16>, vector<16x64xf32> -> vector<16x64xf32>
    %c0_7 = arith.constant 0 : index
    %c0_8 = arith.constant 0 : index
    %9 = vector.load %arg3[%c0_7, %c0_8] : memref<1x64xf32, #tpu.memory_space<vmem>>, vector<1x64xf32>
    %10 = vector.broadcast %9 : vector<1x64xf32> to vector<16x64xf32>
    %11 = arith.addf %8, %10 : vector<16x64xf32>
    %cst_9 = arith.constant 0.000000e+00 : f32
    %12 = vector.broadcast %cst_9 : f32 to vector<16x64xf32>
    %13 = arith.maximumf %11, %12 : vector<16x64xf32>
    %14 = arith.truncf %13 : vector<16x64xf32> to vector<16x64xbf16>
    %cst_10 = arith.constant dense<0.000000e+00> : vector<16x64xf32>
    %15 = tpu.matmul %14, %5, %cst_10 {dimension_numbers = #tpu.dot_dimension_numbers<[1], [0], [0], [1], [0, 0, 1, 1], [], []>} : vector<16x64xbf16>, vector<64x64xbf16>, vector<16x64xf32> -> vector<16x64xf32>
    %c0_11 = arith.constant 0 : index
    %c0_12 = arith.constant 0 : index
    %16 = vector.load %arg5[%c0_11, %c0_12] : memref<1x64xf32, #tpu.memory_space<vmem>>, vector<1x64xf32>
    %17 = vector.broadcast %16 : vector<1x64xf32> to vector<16x64xf32>
    %18 = arith.addf %15, %17 : vector<16x64xf32>
    %cst_13 = arith.constant 0.000000e+00 : f32
    %19 = vector.broadcast %cst_13 : f32 to vector<16x64xf32>
    %20 = arith.maximumf %18, %19 : vector<16x64xf32>
    %21 = arith.truncf %20 : vector<16x64xf32> to vector<16x64xbf16>
    %cst_14 = arith.constant dense<0.000000e+00> : vector<16x4xf32>
    %22 = tpu.matmul %21, %7, %cst_14 {dimension_numbers = #tpu.dot_dimension_numbers<[1], [0], [0], [1], [0, 0, 1, 1], [], []>} : vector<16x64xbf16>, vector<64x4xbf16>, vector<16x4xf32> -> vector<16x4xf32>
    %c0_15 = arith.constant 0 : index
    %c0_16 = arith.constant 0 : index
    %23 = vector.load %arg7[%c0_15, %c0_16] : memref<1x4xf32, #tpu.memory_space<vmem>>, vector<1x4xf32>
    %24 = vector.broadcast %23 : vector<1x4xf32> to vector<16x4xf32>
    %25 = arith.addf %22, %24 : vector<16x4xf32>
    %c0_17 = arith.constant 0 : index
    %c0_18 = arith.constant 0 : index
    %26 = vector.load %arg8[%c0_17, %c0_18] : memref<16x4xf32, #tpu.memory_space<vmem>>, vector<16x4xf32>
    tpu.vector_store %arg8[%c0_17, %c0_18], %25 {strides = array<i32>} : memref<16x4xf32, #tpu.memory_space<vmem>>, vector<16x4xf32>,
    return
  }
  func.func @transform_0(%arg0: i32) -> (i32, i32) {
    %c0_i32 = arith.constant 0 : i32
    %c0_i32_0 = arith.constant 0 : i32
    return %arg0, %c0_i32 : i32, i32
  }
  func.func @transform_1(%arg0: i32) -> (i32, i32) {
    %c0_i32 = arith.constant 0 : i32
    %c0_i32_0 = arith.constant 0 : i32
    %c0_i32_1 = arith.constant 0 : i32
    return %c0_i32, %c0_i32_0 : i32, i32
  }
  func.func @transform_2(%arg0: i32) -> (i32, i32) {
    %c0_i32 = arith.constant 0 : i32
    %c0_i32_0 = arith.constant 0 : i32
    %c0_i32_1 = arith.constant 0 : i32
    return %c0_i32, %c0_i32_0 : i32, i32
  }
  func.func @transform_3(%arg0: i32) -> (i32, i32) {
    %c0_i32 = arith.constant 0 : i32
    %c0_i32_0 = arith.constant 0 : i32
    %c0_i32_1 = arith.constant 0 : i32
    return %c0_i32, %c0_i32_0 : i32, i32
  }
  func.func @transform_4(%arg0: i32) -> (i32, i32) {
    %c0_i32 = arith.constant 0 : i32
    %c0_i32_0 = arith.constant 0 : i32
    %c0_i32_1 = arith.constant 0 : i32
    return %c0_i32, %c0_i32_0 : i32, i32
  }
  func.func @transform_5(%arg0: i32) -> (i32, i32) {
    %c0_i32 = arith.constant 0 : i32
    %c0_i32_0 = arith.constant 0 : i32
    %c0_i32_1 = arith.constant 0 : i32
    return %c0_i32, %c0_i32_0 : i32, i32
  }
  func.func @transform_6(%arg0: i32) -> (i32, i32) {
    %c0_i32 = arith.constant 0 : i32
    %c0_i32_0 = arith.constant 0 : i32
    %c0_i32_1 = arith.constant 0 : i32
    return %c0_i32, %c0_i32_0 : i32, i32
  }
  func.func @transform_7(%arg0: i32) -> (i32, i32) {
    %c0_i32 = arith.constant 0 : i32
    %c0_i32_0 = arith.constant 0 : i32
    return %arg0, %c0_i32 : i32, i32
  }
}

</mosaic_0001>

<bundles_post_ra>
// kernel: tpu_custom_call.1
= control target key start
LH: loop header
LB: loop body
LE: loop exit
PB: predicated region body
PF: predicated region fallthrough
CT: control target
= control target key end

     0   :  { %v278_v0 = vmov 0.0   ;;  %vm67_vm0 = vcmask 1043456   ;;  %vm279_vm1 = vmmov 0   ;;  %vm63_vm2 = vcmask 64512   ;;  %s409_s1 = inlined_call_operand.vmem [shape: f32[8,64], index: 1, kind: input, shape index: {}]   ;;  %s410_s0 = inlined_call_operand.vmem [shape: f32[16,8], index: 0, kind: input, shape index: {}]   ;;  %s411_s3 = inlined_call_operand.vmem [shape: f32[64,64], index: 3, kind: input, shape index: {}]   ;;  %s412_s5 = inlined_call_operand.vmem [shape: f32[64,4], index: 5, kind: input, shape index: {}]   ;;  %s413_s2 = inlined_call_operand.vmem [shape: f32[1,64], index: 2, kind: input, shape index: {}]   ;;  %s414_s4 = inlined_call_operand.vmem [shape: f32[1,64], index: 4, kind: input, shape index: {}]   ;;  %s415_s6 = inlined_call_operand.vmem [shape: f32[1,4], index: 6, kind: input, shape index: {}]   ;;  %s416_s7 = inlined_call_operand.vmem [shape: f32[16,4], index: 7, kind: output, shape index: {}]  }
   0x1   :  { %246 = vmatprep.subr.bf16.mxu0 %v278_v0  ;;  %v30_v1 = vld [vmem:[%s409_s1] sm:$0xff]  ;;  %248 = vmatprep.mubr.msk.bf16.mxu0 %vm279_vm1, %v278_v0  ;;  %v28_v3 = vld [vmem:[%s410_s0 + $0x8] sm:$0xff]  ;;  %v38_v5 = vld [vmem:[%s411_s3 + $0x30] sm:$0xff]  ;;  %vm122_vm3 = vcmask 523264   ;;  %vm221_vm4 = vcmask 31744  }
   0x2   :  { %v27_v2 = vld [vmem:[%s410_s0] sm:$0xff]  ;;  %v31_v4 = vpack.c.bf16 %v30_v1, %v30_v1  ;;  %252 = vmatprep.subr.bf16.mxu1 %v278_v0  ;;  %v39_v6 = vld [vmem:[%s411_s3 + $0x38] sm:$0xff]  ;;  %260 = vmatprep.mubr.msk.bf16.mxu1 %vm279_vm1, %v278_v0  ;;  %v37_v11 = vld [vmem:[%s411_s3 + $0x28] sm:$0xff] }
   0x3   :  { %v43_v7 = vpack.c.bf16 %v39_v6, %v38_v5  ;;  %v29_v9 = vpack.c.bf16 %v28_v3, %v27_v2  ;;  %v36_v10 = vld [vmem:[%s411_s3 + $0x20] sm:$0xff]  ;;  %v34_v13 = vld [vmem:[%s411_s3 + $0x10] sm:$0xff]  ;;  %v35_v14 = vld [vmem:[%s411_s3 + $0x18] sm:$0xff] }
   0x4   :  { %v69_v8 = vsel %vm67_vm0, %v31_v4, 0  ;;  %v42_v12 = vpack.c.bf16 %v37_v11, %v36_v10  ;;  %v41_v15 = vpack.c.bf16 %v35_v14, %v34_v13  ;;  %v32_v16 = vld [vmem:[%s411_s3] sm:$0xff]  ;;  %v33_v17 = vld [vmem:[%s411_s3 + $0x8] sm:$0xff]  ;;  %v50_v19 = vld [vmem:[%s412_s5 + $0x30] sm:$0xff] }
   0x5   :  { %247 = vmatpush3.bf16.msra.mxu0 %v69_v8  ;;  %253 = vmatpush3.bf16.msra.mxu1 %v43_v7  ;;  %v40_v18 = vpack.c.bf16 %v33_v17, %v32_v16  ;;  %v51_v20 = vld [vmem:[%s412_s5 + $0x38] sm:$0xff]  ;;  %v228_v22 = vld [vmem:[%s413_s2] ss:$0 sm:$0xff]  ;;  %v49_v33 = vld [vmem:[%s412_s5 + $0x28] sm:$0xff] }
   0x6   :  { %254 = vmatprep.subr.bf16.mxu1 %v278_v0  ;;  %264 = vmatprep.subr.bf16.mxu0 %v278_v0  ;;  %v55_v21 = vpack.c.bf16 %v51_v20, %v50_v19  ;;  %v48_v32 = vld [vmem:[%s412_s5 + $0x20] sm:$0xff]  ;;  %v46_v35 = vld [vmem:[%s412_s5 + $0x10] sm:$0xff]  ;;  %v47_v36 = vld [vmem:[%s412_s5 + $0x18] sm:$0xff] }
   0x7   :  { %v54_v34 = vpack.c.bf16 %v49_v33, %v48_v32  ;;  %v53_v37 = vpack.c.bf16 %v47_v36, %v46_v35  ;;  %v44_v38 = vld [vmem:[%s412_s5] sm:$0xff]  ;;  %v45_v39 = vld [vmem:[%s412_s5 + $0x8] sm:$0xff] }
   0x8   :  { %249 = vmatmul.mubr.msk.bf16.vlgmr.msra.gmra.mxu0 %vm63_vm2, %v29_v9  ;;  %v52_v40 = vpack.c.bf16 %v45_v39, %v44_v38  ;;  %v230_v41 = vld [vmem:[%s414_s4] ss:$0 sm:$0xff] }
   0x9   :  { %272 = vmatprep.mubr.msk.bf16.mxu0 %vm279_vm1, %v278_v0  ;;  %255 = vmatpush3.bf16.msra.mxu1 %v42_v12  ;;  %v232_v51 = vld [vmem:[%s415_s6] ss:$0 sm:$0xff] }
   0xa   :  { %256 = vmatprep.subr.bf16.mxu1 %v278_v0  ;;  %265 = vmatpush3.bf16.msra.mxu0 %v55_v21 }
   0xb   :  { %266 = vmatprep.subr.bf16.mxu0 %v278_v0 }
   0xd   :  { %257 = vmatpush3.bf16.msra.mxu1 %v41_v15 }
   0xe   :  { %258 = vmatprep.subr.bf16.mxu1 %v278_v0  ;;  %267 = vmatpush3.bf16.msra.mxu0 %v54_v34 }
   0xf   :  { %268 = vmatprep.subr.bf16.mxu0 %v278_v0 }
  0x11   :  { %259 = vmatpush3.bf16.msra.mxu1 %v40_v18 }
  0x12   :  { %269 = vmatpush3.bf16.msra.mxu0 %v53_v37 }
  0x13   :  { %270 = vmatprep.subr.bf16.mxu0 %v278_v0 }
  0x16   :  { %271 = vmatpush3.bf16.msra.mxu0 %v52_v40 }
  0xc8   :  { %v105_v23 = vpop.f32.mrf.mxu0 }
  0xc9   :  { %v106_v25 = vadd.f32 %v228_v22, %v105_v23 }
  0xca   :  { %v250_v24 = vpop.f32.mrf.mxu0 }
  0xcb   :  { %v112_v29 = vmax.f32 %v106_v25, 0.0 }
  0xcc   :  { %v108_v26 = vpop.f32.mrf.mxu0 }
  0xcd   :  { %v109_v27 = vadd.f32 %v228_v22, %v108_v26 }
  0xce   :  { %v251_v28 = vpop.f32.mrf.mxu0 }
  0xcf   :  { %v113_v30 = vmax.f32 %v109_v27, 0.0 }
  0xd1   :  { %v114_v31 = vpack.c.bf16 %v113_v30, %v112_v29 }
  0xd3   :  { %261 = vmatmul.mubr.msk.bf16.vlgmr.msra.gmra.mxu1 %vm122_vm3, %v114_v31 }
 0x193   :  { %v160_v42 = vpop.f32.mrf.mxu1 }
 0x194   :  { %v161_v44 = vadd.f32 %v230_v41, %v160_v42 }
 0x195   :  { %v262_v43 = vpop.f32.mrf.mxu1 }
 0x196   :  { %v167_v48 = vmax.f32 %v161_v44, 0.0 }
 0x197   :  { %v163_v45 = vpop.f32.mrf.mxu1 }
 0x198   :  { %v164_v46 = vadd.f32 %v230_v41, %v163_v45 }
 0x199   :  { %v263_v47 = vpop.f32.mrf.mxu1 }
 0x19a   :  { %v168_v49 = vmax.f32 %v164_v46, 0.0 }
 0x19c   :  { %v169_v50 = vpack.c.bf16 %v168_v49, %v167_v48 }
 0x19e   :  { %273 = vmatmul.mubr.msk.bf16.vlgmr.msra.gmra.mxu0 %vm122_vm3, %v169_v50 }
 0x25e   :  { %v214_v52 = vpop.f32.mrf.mxu0 }
 0x25f   :  { %v215_v53 = vadd.f32 %v232_v51, %v214_v52 }
 0x260   :  { %v274_v54 = vpop.f32.mrf.mxu0 }
 0x261   :  { %222 = vst.msk [vmem:[%s416_s7] sm:$0xff] %vm221_vm4, %v215_v53 }
 0x262   :  { %v217_v55 = vpop.f32.mrf.mxu0 }
 0x263   :  { %v218_v56 = vadd.f32 %v232_v51, %v217_v55 }
 0x264   :  { %v275_v57 = vpop.f32.mrf.mxu0 }
 0x265   :  { %223 = vst.msk [vmem:[%s416_s7 + $0x8] sm:$0xff] %vm221_vm4, %v218_v56 }

</bundles_post_ra>
